<compile_context>
chip_gen: v6e
topology: v6e:2x2x1
jax: 0.10.0
libtpu: 0.0.40
codegen_flags: <defaults>
</compile_context>

<pallas_src>
import functools

import jax
import jax.numpy as jnp
import numpy as np
from jax.experimental import pallas as pl
from jax.experimental.pallas import tpu as pltpu


# ----------------------------- kernel -------------------------------------- #

def _cond_layernorm_kernel(x_ref, mem_ref, w1_ref, b1_ref,
                           wg2_ref, wb2_ref, gamma_p_ref, beta_p_ref,
                           o_ref, *, eps, d_model):
    """ConditionalLayerNorm over a tile of rows.

    x_ref:       (tr, D)     rows of x
    mem_ref:     (tr, M)     rows of memory (M = rm_num_slots * rm_d_model)
    w1_ref:      (M, 2D)     [wg1 | wb1] fused first-layer weights
    b1_ref:      (1, 2D)     [bg1 | bb1]
    wg2/wb2_ref: (D, D)      second-layer weights
    gamma_p_ref: (1, D)      gamma + bg2 (pre-folded)
    beta_p_ref:  (1, D)      beta  + bb2 (pre-folded)
    """
    x = x_ref[...].astype(jnp.float32)          # stats always in f32
    m = mem_ref[...]

    # Fused first layers of mlp_gamma / mlp_beta: single (tr,M)@(M,2D) matmul.
    h = jnp.maximum(
        jnp.dot(m, w1_ref[...], preferred_element_type=jnp.float32)
        + b1_ref[...].astype(jnp.float32),
        0.0)
    hg = h[:, :d_model]
    hb = h[:, d_model:]

    # gamma_hat = gamma + bg2 + hg @ wg2 ; beta_hat = beta + bb2 + hb @ wb2
    gamma_hat = (jnp.dot(hg.astype(wg2_ref.dtype), wg2_ref[...],
                         preferred_element_type=jnp.float32)
                 + gamma_p_ref[...])
    beta_hat = (jnp.dot(hb.astype(wb2_ref.dtype), wb2_ref[...],
                        preferred_element_type=jnp.float32)
                + beta_p_ref[...])

    d = x.shape[-1]
    mean = jnp.mean(x, axis=-1, keepdims=True)
    centered = x - mean
    # torch .std(): unbiased (Bessel, divide by D-1); eps added to std.
    var = jnp.sum(centered * centered, axis=-1, keepdims=True) / (d - 1)
    inv = 1.0 / (jnp.sqrt(var) + eps)           # one exact reciprocal per row
    o_ref[...] = (gamma_hat * centered * inv + beta_hat).astype(o_ref.dtype)


# ----------------------------- wrappers ------------------------------------ #

def _fuse_params(params, matmul_dtype=None):
    """Fold constants once: concat first-layer weights, pre-add second biases."""
    w1 = jnp.concatenate([params["wg1"], params["wb1"]], axis=1)   # (M, 2D)
    b1 = jnp.concatenate([params["bg1"], params["bb1"]], axis=1)   # (1, 2D)
    wg2, wb2 = params["wg2"], params["wb2"]
    if matmul_dtype is not None:
        w1 = w1.astype(matmul_dtype)
        wg2 = wg2.astype(matmul_dtype)
        wb2 = wb2.astype(matmul_dtype)
    return {
        "w1": w1, "b1": b1, "wg2": wg2, "wb2": wb2,
        "gamma_p": params["gamma"] + params["bg2"],
        "beta_p": params["beta"] + params["bb2"],
    }


def _choose_row_tile(n_rows, d_model, m_feat, itemsize=4,
                     vmem_budget_bytes=44 * 1024 * 1024, max_tile=1024):
    """Largest row tile (multiple of 8) whose pipelined buffers fit the budget,
    while keeping the grid >= 2 steps so v7x can shard across its 2 TCs."""
    d, m = d_model, m_feat
    # weights/biases, double-buffered by the default pipeline
    fixed = 2 * itemsize * (m * 2 * d + 2 * d + 2 * d * d + 4 * d)
    avail = max(vmem_budget_bytes - fixed, 8 * (2 * itemsize * (m + 2 * d)))
    # per-row: double-buffered x/memory/out tiles + f32 intermediates
    per_row = 2 * itemsize * (m + 2 * d) + 4 * (2 * d + 4 * d)
    tr = avail // max(per_row, 1)
    tr = min(tr, max_tile, max(n_rows, 8))
    if n_rows > 8:
        tr = min(tr, max(8, n_rows // 2))       # keep >= 2 grid steps
    return max(8, (int(tr) // 8) * 8)


def conditional_layer_norm(x, memory, params, *, eps=1e-6, row_tile=None,
                           matmul_dtype=None,
                           vmem_limit_bytes=56 * 1024 * 1024):
    """x: (B, T, D); memory: (B, T, M).  Returns (B, T, D)."""
    B, T, D = x.shape
    M = memory.shape[-1]
    N = B * T

    fp = _fuse_params(params, matmul_dtype)

    if row_tile is None:
        row_tile = _choose_row_tile(N, D, M, itemsize=x.dtype.itemsize)

    n_pad = pl.cdiv(N, row_tile) * row_tile
    xf = x.reshape(N, D)
    mf = memory.reshape(N, M)
    if matmul_dtype is not None:
        mf = mf.astype(matmul_dtype)
    if n_pad != N:                              # ragged B*T: zero-pad the tail
        xf = jnp.pad(xf, ((0, n_pad - N), (0, 0)))
        mf = jnp.pad(mf, ((0, n_pad - N), (0, 0)))

    def row_spec(width):
        return pl.BlockSpec((row_tile, width), lambda i: (i, 0))

    def full_spec(shape):
        return pl.BlockSpec(shape, lambda i: (0,) * len(shape))

    out = pl.pallas_call(
        functools.partial(_cond_layernorm_kernel, eps=eps, d_model=D),
        out_shape=jax.ShapeDtypeStruct((n_pad, D), x.dtype),
        grid_spec=pltpu.PrefetchScalarGridSpec(
            num_scalar_prefetch=0,
            grid=(n_pad // row_tile,),
            in_specs=[
                row_spec(D),                    # x rows
                row_spec(M),                    # memory rows
                full_spec((M, 2 * D)),          # fused [wg1 | wb1]
                full_spec((1, 2 * D)),          # fused [bg1 | bb1]
                full_spec((D, D)),              # wg2
                full_spec((D, D)),              # wb2
                full_spec((1, D)),              # gamma + bg2
                full_spec((1, D)),              # beta  + bb2
            ],
            out_specs=row_spec(D)),
        compiler_params=pltpu.CompilerParams(
            dimension_semantics=("parallel",),
            vmem_limit_bytes=vmem_limit_bytes),
    )(xf, mf, fp["w1"], fp["b1"], fp["wg2"], fp["wb2"],
      fp["gamma_p"], fp["beta_p"])

    return out[:N].reshape(B, T, D)


def conditional_sublayer_connection(x, sublayer, memory, params, *, eps=1e-6,
                                    row_tile=None, matmul_dtype=None):
    """x + dropout(sublayer(ConditionalLayerNorm(x, memory)))."""
    y = conditional_layer_norm(x, memory, params, eps=eps, row_tile=row_tile,
                               matmul_dtype=matmul_dtype)
    s = sublayer(y)                 # arbitrary user sublayer (plain JAX glue)
    # TODO(synk): nn.Dropout is stochastic at train time; eval-mode identity here.
    # Residual add stays in plain JAX: XLA fuses it into the sublayer epilogue,
    # avoiding an extra HBM round trip of x and s.
    return x + s


# --------------------------- parameter setup ------------------------------- #

def xavier_uniform(key, fan_in, fan_out, dtype=jnp.float32):
    bound = float(np.sqrt(6.0 / (fan_in + fan_out)))
    return jax.random.uniform(key, (fan_in, fan_out), dtype, -bound, bound)


def init_params(key, d_model, rm_num_slots, rm_d_model):
    assert d_model == rm_d_model, "module only type-checks when d_model == rm_d_model"
    M = rm_num_slots * rm_d_model
    D = d_model
    ks = jax.random.split(key, 4)
    bias = lambda n: jnp.full((1, n), 0.1, jnp.float32)   # nn.init.constant_(bias, 0.1)
    return {
        "wg1": xavier_uniform(ks[0], M, D), "bg1": bias(D),
        "wg2": xavier_uniform(ks[1], D, D), "bg2": bias(D),
        "wb1": xavier_uniform(ks[2], M, D), "bb1": bias(D),
        "wb2": xavier_uniform(ks[3], D, D), "bb2": bias(D),
        "gamma": jnp.ones((1, D), jnp.float32),
        "beta": jnp.zeros((1, D), jnp.float32),
    }


# --------------------------- pure-JAX reference ----------------------------- #

def _reference(x, sublayer, memory, params, eps=1e-6):
    def mlp(m, w1, b1, w2, b2):
        return jnp.maximum(m @ w1 + b1[0], 0.0) @ w2 + b2[0]

    mean = jnp.mean(x, axis=-1, keepdims=True)
    std = jnp.std(x, axis=-1, keepdims=True, ddof=1)
    dg = mlp(memory, params["wg1"], params["bg1"], params["wg2"], params["bg2"])
    db = mlp(memory, params["wb1"], params["bb1"], params["wb2"], params["bb2"])
    gamma_hat = params["gamma"][0] + dg
    beta_hat = params["beta"][0] + db
    y = gamma_hat * (x - mean) / (std + eps) + beta_hat
    return x + sublayer(y)


# --------------------------------- main ------------------------------------ #

if __name__ == "__main__":
    B, T = 2, 7                      # B*T = 14: exercises the ragged-N padding path
    d_model = rm_d_model = 128       # lane-dense (multiple of 128) last dim
    rm_num_slots = 3
    M = rm_num_slots * rm_d_model

    key = jax.random.PRNGKey(0)
    kx, kmem, kparams, ksub = jax.random.split(key, 4)

    x = jax.random.normal(kx, (B, T, d_model), jnp.float32)
    memory = jax.random.normal(kmem, (B, T, M), jnp.float32)
    params = init_params(kparams, d_model, rm_num_slots, rm_d_model)

    # Example sublayer: a deterministic linear projection (stand-in for attn/ffn).
    ws = xavier_uniform(ksub, d_model, d_model)
    bs = jnp.full((d_model,), 0.05, jnp.float32)
    sublayer = lambda y: y @ ws + bs

    out = conditional_sublayer_connection(x, sublayer, memory, params)
    out = jax.block_until_ready(out)

    ref = _reference(x, sublayer, memory, params)
    np.testing.assert_allclose(np.asarray(out), np.asarray(ref), rtol=5e-5, atol=5e-5)

    print("KERNEL_OK")
</pallas_src>

<mosaic_0001>
module attributes {stable_mosaic.version = 11 : i64} {
  func.func @_cond_layernorm_kernel(%arg0: i32, %arg1: memref<8x128xf32, #tpu.memory_space<vmem>>, %arg2: memref<8x384xf32, #tpu.memory_space<vmem>>, %arg3: memref<384x256xf32, #tpu.memory_space<vmem>>, %arg4: memref<1x256xf32, #tpu.memory_space<vmem>>, %arg5: memref<128x128xf32, #tpu.memory_space<vmem>>, %arg6: memref<128x128xf32, #tpu.memory_space<vmem>>, %arg7: memref<1x128xf32, #tpu.memory_space<vmem>>, %arg8: memref<1x128xf32, #tpu.memory_space<vmem>>, %arg9: memref<8x128xf32, #tpu.memory_space<vmem>>) attributes {dimension_semantics = [#tpu.dimension_semantics<parallel>], iteration_bounds = array<i64: 2>, scalar_prefetch = 0 : i64, scratch_operands = 0 : i64, tpu.core_type = #tpu.core_type<tc>, window_params = [{transform_indices = @transform_0, window_bounds = array<i64: 8, 128>}, {transform_indices = @transform_1, window_bounds = array<i64: 8, 384>}, {pipeline_mode = #tpu.pipeline_mode<synchronous>, transform_indices = @transform_2, window_bounds = array<i64: 384, 256>}, {pipeline_mode = #tpu.pipeline_mode<synchronous>, transform_indices = @transform_3, window_bounds = array<i64: 1, 256>}, {pipeline_mode = #tpu.pipeline_mode<synchronous>, transform_indices = @transform_4, window_bounds = array<i64: 128, 128>}, {pipeline_mode = #tpu.pipeline_mode<synchronous>, transform_indices = @transform_5, window_bounds = array<i64: 128, 128>}, {pipeline_mode = #tpu.pipeline_mode<synchronous>, transform_indices = @transform_6, window_bounds = array<i64: 1, 128>}, {pipeline_mode = #tpu.pipeline_mode<synchronous>, transform_indices = @transform_7, window_bounds = array<i64: 1, 128>}, {transform_indices = @transform_8, window_bounds = array<i64: 8, 128>}]} {
    %c0 = arith.constant 0 : index
    %c0_0 = arith.constant 0 : index
    %0 = vector.load %arg1[%c0, %c0_0] : memref<8x128xf32, #tpu.memory_space<vmem>>, vector<8x128xf32>
    %c0_1 = arith.constant 0 : index
    %c0_2 = arith.constant 0 : index
    %1 = vector.load %arg2[%c0_1, %c0_2] : memref<8x384xf32, #tpu.memory_space<vmem>>, vector<8x384xf32>
    %c0_3 = arith.constant 0 : index
    %c0_4 = arith.constant 0 : index
    %2 = vector.load %arg3[%c0_3, %c0_4] : memref<384x256xf32, #tpu.memory_space<vmem>>, vector<384x256xf32>
    %cst = arith.constant dense<0.000000e+00> : vector<8x256xf32>
    %3 = tpu.matmul %1, %2, %cst {dimension_numbers = #tpu.dot_dimension_numbers<[1], [0], [0], [1], [0, 0, 1, 1], [], []>} : vector<8x384xf32>, vector<384x256xf32>, vector<8x256xf32> -> vector<8x256xf32>
    %c0_5 = arith.constant 0 : index
    %c0_6 = arith.constant 0 : index
    %4 = vector.load %arg4[%c0_5, %c0_6] : memref<1x256xf32, #tpu.memory_space<vmem>>, vector<1x256xf32>
    %5 = vector.broadcast %4 : vector<1x256xf32> to vector<8x256xf32>
    %6 = arith.addf %3, %5 : vector<8x256xf32>
    %cst_7 = arith.constant 0.000000e+00 : f32
    %7 = vector.broadcast %cst_7 : f32 to vector<8x256xf32>
    %8 = arith.maximumf %6, %7 : vector<8x256xf32>
    %9 = vector.extract_strided_slice %8 {offsets = [0, 0], sizes = [8, 128], strides = [1, 1]} : vector<8x256xf32> to vector<8x128xf32>
    %10 = vector.extract_strided_slice %8 {offsets = [0, 128], sizes = [8, 128], strides = [1, 1]} : vector<8x256xf32> to vector<8x128xf32>
    %c0_8 = arith.constant 0 : index
    %c0_9 = arith.constant 0 : index
    %11 = vector.load %arg5[%c0_8, %c0_9] : memref<128x128xf32, #tpu.memory_space<vmem>>, vector<128x128xf32>
    %cst_10 = arith.constant dense<0.000000e+00> : vector<8x128xf32>
    %12 = tpu.matmul %9, %11, %cst_10 {dimension_numbers = #tpu.dot_dimension_numbers<[1], [0], [0], [1], [0, 0, 1, 1], [], []>} : vector<8x128xf32>, vector<128x128xf32>, vector<8x128xf32> -> vector<8x128xf32>
    %c0_11 = arith.constant 0 : index
    %c0_12 = arith.constant 0 : index
    %13 = vector.load %arg7[%c0_11, %c0_12] : memref<1x128xf32, #tpu.memory_space<vmem>>, vector<1x128xf32>
    %14 = vector.broadcast %13 : vector<1x128xf32> to vector<8x128xf32>
    %15 = arith.addf %12, %14 : vector<8x128xf32>
    %c0_13 = arith.constant 0 : index
    %c0_14 = arith.constant 0 : index
    %16 = vector.load %arg6[%c0_13, %c0_14] : memref<128x128xf32, #tpu.memory_space<vmem>>, vector<128x128xf32>
    %cst_15 = arith.constant dense<0.000000e+00> : vector<8x128xf32>
    %17 = tpu.matmul %10, %16, %cst_15 {dimension_numbers = #tpu.dot_dimension_numbers<[1], [0], [0], [1], [0, 0, 1, 1], [], []>} : vector<8x128xf32>, vector<128x128xf32>, vector<8x128xf32> -> vector<8x128xf32>
    %c0_16 = arith.constant 0 : index
    %c0_17 = arith.constant 0 : index
    %18 = vector.load %arg8[%c0_16, %c0_17] : memref<1x128xf32, #tpu.memory_space<vmem>>, vector<1x128xf32>
    %19 = vector.broadcast %18 : vector<1x128xf32> to vector<8x128xf32>
    %20 = arith.addf %17, %19 : vector<8x128xf32>
    %cst_18 = arith.constant dense<0.000000e+00> : vector<8xf32>
    %21 = vector.multi_reduction <add>, %0, %cst_18 [1] : vector<8x128xf32> to vector<8xf32>
    %22 = vector.shape_cast %21 : vector<8xf32> to vector<8x1xf32>
    %cst_19 = arith.constant 1.280000e+02 : f32
    %23 = vector.broadcast %cst_19 : f32 to vector<8x1xf32>
    %24 = arith.divf %22, %23 : vector<8x1xf32>
    %25 = vector.broadcast %24 : vector<8x1xf32> to vector<8x128xf32>
    %26 = arith.subf %0, %25 : vector<8x128xf32>
    %27 = arith.mulf %26, %26 : vector<8x128xf32>
    %cst_20 = arith.constant dense<0.000000e+00> : vector<8xf32>
    %28 = vector.multi_reduction <add>, %27, %cst_20 [1] : vector<8x128xf32> to vector<8xf32>
    %29 = vector.shape_cast %28 : vector<8xf32> to vector<8x1xf32>
    %cst_21 = arith.constant 1.270000e+02 : f32
    %30 = vector.broadcast %cst_21 : f32 to vector<8x1xf32>
    %31 = arith.divf %29, %30 : vector<8x1xf32>
    %32 = math.sqrt %31 : vector<8x1xf32>
    %cst_22 = arith.constant 9.99999997E-7 : f32
    %33 = vector.broadcast %cst_22 : f32 to vector<8x1xf32>
    %34 = arith.addf %32, %33 : vector<8x1xf32>
    %cst_23 = arith.constant 1.000000e+00 : f32
    %35 = vector.broadcast %cst_23 : f32 to vector<8x1xf32>
    %36 = arith.divf %35, %34 : vector<8x1xf32>
    %37 = arith.mulf %15, %26 : vector<8x128xf32>
    %38 = vector.broadcast %36 : vector<8x1xf32> to vector<8x128xf32>
    %39 = arith.mulf %37, %38 : vector<8x128xf32>
    %40 = arith.addf %39, %20 : vector<8x128xf32>
    %c0_24 = arith.constant 0 : index
    %c0_25 = arith.constant 0 : index
    %41 = vector.load %arg9[%c0_24, %c0_25] : memref<8x128xf32, #tpu.memory_space<vmem>>, vector<8x128xf32>
    tpu.vector_store %arg9[%c0_24, %c0_25], %40 {strides = array<i32>} : memref<8x128xf32, #tpu.memory_space<vmem>>, vector<8x128xf32>,
    return
  }
  func.func @transform_0(%arg0: i32) -> (i32, i32) {
    %c0_i32 = arith.constant 0 : i32
    %c0_i32_0 = arith.constant 0 : i32
    return %arg0, %c0_i32 : i32, i32
  }
  func.func @transform_1(%arg0: i32) -> (i32, i32) {
    %c0_i32 = arith.constant 0 : i32
    %c0_i32_0 = arith.constant 0 : i32
    return %arg0, %c0_i32 : i32, i32
  }
  func.func @transform_2(%arg0: i32) -> (i32, i32) {
    %c0_i32 = arith.constant 0 : i32
    %c0_i32_0 = arith.constant 0 : i32
    %c0_i32_1 = arith.constant 0 : i32
    return %c0_i32, %c0_i32_0 : i32, i32
  }
  func.func @transform_3(%arg0: i32) -> (i32, i32) {
    %c0_i32 = arith.constant 0 : i32
    %c0_i32_0 = arith.constant 0 : i32
    %c0_i32_1 = arith.constant 0 : i32
    return %c0_i32, %c0_i32_0 : i32, i32
  }
  func.func @transform_4(%arg0: i32) -> (i32, i32) {
    %c0_i32 = arith.constant 0 : i32
    %c0_i32_0 = arith.constant 0 : i32
    %c0_i32_1 = arith.constant 0 : i32
    return %c0_i32, %c0_i32_0 : i32, i32
  }
  func.func @transform_5(%arg0: i32) -> (i32, i32) {
    %c0_i32 = arith.constant 0 : i32
    %c0_i32_0 = arith.constant 0 : i32
    %c0_i32_1 = arith.constant 0 : i32
    return %c0_i32, %c0_i32_0 : i32, i32
  }
  func.func @transform_6(%arg0: i32) -> (i32, i32) {
    %c0_i32 = arith.constant 0 : i32
    %c0_i32_0 = arith.constant 0 : i32
    %c0_i32_1 = arith.constant 0 : i32
    return %c0_i32, %c0_i32_0 : i32, i32
  }
  func.func @transform_7(%arg0: i32) -> (i32, i32) {
    %c0_i32 = arith.constant 0 : i32
    %c0_i32_0 = arith.constant 0 : i32
    %c0_i32_1 = arith.constant 0 : i32
    return %c0_i32, %c0_i32_0 : i32, i32
  }
  func.func @transform_8(%arg0: i32) -> (i32, i32) {
    %c0_i32 = arith.constant 0 : i32
    %c0_i32_0 = arith.constant 0 : i32
    return %arg0, %c0_i32 : i32, i32
  }
}

</mosaic_0001>

<bundles_post_ra>
// kernel: tpu_custom_call.1
= control target key start
LH: loop header
LB: loop body
LE: loop exit
PB: predicated region body
PF: predicated region fallthrough
CT: control target
= control target key end

     0   :  { %s1773_s0 = inlined_call_operand.hbm [shape: f32[16,128], index: 0, kind: input, shape index: {}]   ;;  %s1774_s1 = inlined_call_operand.hbm [shape: f32[16,384], index: 1, kind: input, shape index: {}]   ;;  %s1775_s2 = inlined_call_operand.hbm [shape: f32[384,256], index: 2, kind: input, shape index: {}]   ;;  %s1776_s3 = inlined_call_operand.vmem [shape: f32[1,256], index: 3, kind: input, shape index: {}]   ;;  %s1777_s4 = inlined_call_operand.hbm [shape: f32[128,128], index: 4, kind: input, shape index: {}]   ;;  %s1778_s5 = inlined_call_operand.hbm [shape: f32[128,128], index: 5, kind: input, shape index: {}]   ;;  %s1779_s6 = inlined_call_operand.vmem [shape: f32[1,128], index: 6, kind: input, shape index: {}]   ;;  %s1780_s7 = inlined_call_operand.vmem [shape: f32[1,128], index: 7, kind: input, shape index: {}]   ;;  %s1781_s8 = inlined_call_operand.hbm [shape: f32[16,128], index: 8, kind: output, shape index: {}]  }
   0x1   :  { %1786 = sst [smem:[#allocation17_spill]] %s1773_s0 }
   0x2   :  { %1787 = sst [smem:[#allocation18_spill]] %s1775_s2 }
   0x3   :  { %1788 = sst [smem:[#allocation19_spill]] %s1777_s4 }
   0x4   :  { %1789 = sst [smem:[#allocation20_spill]] %s1778_s5 }
   0x5   :  { %13 = vsyncpa [#allocation3], 0 }
   0x6   :  { %15 = vsyncpa [#allocation3 + $0x1], 0 }
   0x7   :  { %16 = vsyncpa [#allocation6], 0 }
   0x8   :  { %18 = vsyncpa [#allocation6 + $0x1], 0 }
   0x9   :  { %19 = vsyncpa [#allocation9], 0 }
   0xa   :  { %20 = vsyncpa [#allocation4], 0 }
   0xb   :  { %22 = vsyncpa [#allocation4 + $0x1], 0  ;;  %s1492_s27 = smov 0   ;;  %s1494_s28 = smov 0  }
   0xc   :  { %s1496_s29 = smov 0   ;;  %s1498_s30 = smov 0  }
   0xd LB: > { %s1513_s9 = sadd.s32 4294967295, %s1433_s30   ;;  %s1003_s10 = sadd.s32 4294967294, %s1433_s30   ;;  %s1433_s30 = sphi %s1498_s30, %s1814_s30   ;;  %s1429_s29 = sphi %s1496_s29, %s1813_s29   ;;  %s1425_s28 = sphi %s1494_s28, %s1812_s28   ;;  %s1421_s27 = sphi %s1492_s27, %s1811_s27  }
   0xe   : > { %p48_p0 = scmp.ne.s32.totalorder %s1425_s28, %s1421_s27  ;;  %p1782_p1 = scmp.eq.s32.totalorder %s1513_s9, 0 }
   0xf   : > { %p230_p3 = scmp.eq.s32.totalorder %s1003_s10, 1  ;;  %p1004_p5 = scmp.ge.s32.totalorder %s1433_s30, 1 }
  0x10   : > { %p1522_p4 = por %p1782_p1, %p48_p0  ;;  %p237_p7 = scmp.lt.s32.totalorder %s1433_s30, 3 }
  0x11   : > { %p1527_p6 = por %p230_p3, %p48_p0  ;;  %s1435_s14 = smov [#allocation7]  }
  0x12   : > { %s1790_s11 = scalar_select %p1522_p4, 1, 0 }
  0x13   : > { %s1791_s12 = scalar_select %p1527_p6, 1, 0 }
  0x14   : > { %p1532_p8 = pnand %p1004_p5, %p237_p7  ;;  %s249_s15 = sshll.u32 %s1435_s14, 4  ;;  %s250_s15 = int_to_ptr.vmem [resolvable:$true] %s249_s15 }
  0x15   : > { %s1436_s17 = smov [#allocation8]   ;;  %s1234_s19 = scalar_lea.vmem %s250_s15, 12288 }
  0x16   : > { %s1792_s13 = scalar_select %p1532_p8, 1, 0 }
  0x17   : > { %p1149_p9 = pneg %p1532_p8  ;;  %s265_s18 = sshll.u32 %s1436_s17, 4  ;;  %s266_s18 = int_to_ptr.vmem [resolvable:$true] %s265_s18 }
  0x18   : > { %p1235_p13 = scmp.ne.s32.totalorder %s250_s15, %s1234_s19  ;;  %p1242_p5 = scmp.lt.s32.totalorder %s250_s15, %s250_s15 }
  0x19   : > { %p1541_p11 = pnand %p1149_p9, %p1782_p1  ;;  %p1243_p7 = scmp.lt.s32.totalorder %s1234_s19, %s1234_s19 }
  0x1b   : > { %p1225_p12 = pneg %p1541_p11  ;;  %p1244_p10 = por %p1243_p7, %p1242_p5 }
  0x1d   : > { %p1237_p0 = pnand %p1235_p13, %p1225_p12 }
  0x1f   : > { %p1238_p3 = pneg %p1237_p0 }
  0x21   : > { %p1245_p9 = pnand %p1244_p10, %p1238_p3 }
  0x23   : > { %1248 = shalt.err (!%p1245_p9)
}
  0x24   : > { %s1437_s20 = smov 256   ;;  %s1438_s21 = smov 16  }
  0x25   : > { %s1794_s2 = sld [smem:[#allocation18_spill]]  ;;  %s1260_s24 = scalar_lea.vmem %s266_s18, 2048 }
  0x26   : > { %p1261_p1 = scmp.ne.s32.totalorder %s266_s18, %s1260_s24  ;;  %p1268_p2 = scmp.lt.s32.totalorder %s266_s18, %s266_s18 }
  0x27   : > { %p1269_p6 = scmp.lt.s32.totalorder %s1260_s24, %s1260_s24 }
  0x28   : > { %p1263_p13 = pnand %p1261_p1, %p1225_p12 }
  0x29   : > { %p1270_p5 = por %p1269_p6, %p1268_p2 }
  0x2a   : > { %p1264_p0 = pneg %p1263_p13 }
  0x2b   : > { %1152 = dma.hbm_to_vmem [thread:$0]  (!%p1541_p11), %s1794_s2, 12288, %s250_s15, [#allocation6], %s1437_s20, %s1437_s20, %s1438_s21  }
  0x2c   : > { %p1271_p10 = pnand %p1270_p5, %p1264_p0 }
  0x2e   : > { %1274 = shalt.err (!%p1271_p10)
}
  0x2f   : > { %s1439_s25 = smov 128   ;;  %s1440_s26 = smov 8  }
  0x30   : > { %s1795_s4 = sld [smem:[#allocation19_spill]]  ;;  %s1441_s15 = smov [#allocation10]  }
  0x31   : > { %s278_s17 = sshll.u32 %s1441_s15, 4  ;;  %s1564_s19 = sadd.s32 1, %s1433_s30   ;;  %s279_s17 = int_to_ptr.vmem [resolvable:$true] %s278_s17 }
  0x32   : > { %s1286_s20 = scalar_lea.vmem %s279_s17, 2048  ;;  %p1294_p3 = scmp.lt.s32.totalorder %s279_s17, %s279_s17 }
  0x33   : > { %p1287_p1 = scmp.ne.s32.totalorder %s279_s17, %s1286_s20  ;;  %p1295_p7 = scmp.lt.s32.totalorder %s1286_s20, %s1286_s20 }
  0x35   : > { %p1289_p2 = pnand %p1287_p1, %p1225_p12  ;;  %p1296_p9 = por %p1295_p7, %p1294_p3 }
  0x36   : > { %1155 = dma.hbm_to_vmem [thread:$0]  (!%p1541_p11), %s1795_s4, 2048, %s266_s18, [#allocation9], %s1439_s25, %s1439_s25, %s1440_s26  }
  0x37   : > { %p1290_p6 = pneg %p1289_p2 }
  0x39   : > { %p1297_p13 = pnand %p1296_p9, %p1290_p6 }
  0x3b   : > { %1300 = shalt.err (!%p1297_p13)
}
  0x3c   : > { %s1796_s5 = sld [smem:[#allocation20_spill]]  ;;  %s32_s22 = ssub.s32 %s1433_s30, %s1564_s19 }
  0x3d   : > { %s35_s23 = sadd.s32 1, %s1429_s29  ;;  %p33_p12 = scmp.eq.s32.totalorder %s32_s22, 0 }
  0x3e   : > { %p42_p0 = scmp.ne.s32.totalorder %s1429_s29, %s1425_s28  ;;  %p43_p5 = scmp.eq.s32.totalorder %s1433_s30, 0 }
  0x3f   : > { %p1173_p10 = scmp.lt.s32.totalorder %s1433_s30, 2  ;;  %p1797_p2 = scmp.eq.s32.totalorder %s1513_s9, 1 }
  0x40   : > { %s1582_s16 = scalar_select %p33_p12, %s1429_s29, %s35_s23  }
  0x41   : > { %p44_p1 = por %p43_p5, %p42_p0  ;;  %p1586_p6 = por %p1797_p2, %p42_p0 }
  0x42   : > { %1158 = dma.hbm_to_vmem [thread:$0]  (!%p1541_p11), %s1796_s5, 2048, %s279_s17, [#allocation9], %s1439_s25, %s1439_s25, %s1440_s26  }
  0x43   : > { %s1798_s24 = scalar_select %p1586_p6, 1, 0 }
  0x44   : > { %s1591_s10 = sand.u32 1, %s1429_s29   ;;  %s1010_s25 = sshll.u32 %s1433_s30, 7 }
  0x45   : > { %s1009_s26 = sshll.u32 %s1591_s10, 3  ;;  %s1799_s0 = sld [smem:[#allocation17_spill]] }
  0x46   : > { %s302_s20 = scalar_lea.vmem [#allocation2], %s1009_s26  ;;  %p1600_p11 = pnand %p1173_p10, %p44_p1 }
  0x47   : > { %s309_s21 = sshll.u32 %s302_s20, 4  ;;  %s299_s23 = scalar_lea.sflag [#allocation3], %s1591_s10  ;;  %s310_s21 = int_to_ptr.vmem [resolvable:$true] %s309_s21 }
  0x48   : > { %p1303_p7 = pneg %p1600_p11 }
  0x4b   : > { %s1598_s17 = scalar_lea.hbm %s1799_s0, %s1010_s25  ;;  %s1306_s14 = scalar_lea.hbm %s1799_s0, 256 }
  0x4c   : > { %s1301_s2 = scalar_lea.hbm %s1598_s17, 128  ;;  %p1307_p12 = scmp.lt.s32.totalorder %s1598_s17, %s1799_s0 }
  0x4d   : > { %p1302_p3 = scmp.ne.s32.totalorder %s1598_s17, %s1301_s2  ;;  %p1308_p0 = scmp.lt.s32.totalorder %s1306_s14, %s1301_s2 }
  0x4f   : > { %p1304_p9 = pnand %p1303_p7, %p1302_p3  ;;  %p1309_p5 = por %p1308_p0, %p1307_p12 }
  0x51   : > { %p1305_p13 = pneg %p1304_p9 }
  0x53   : > { %p1310_p10 = pnand %p1309_p5, %p1305_p13 }
  0x55   : > { %1313 = shalt.err (!%p1310_p10)
}
  0x56   : > { %s1314_s22 = scalar_lea.vmem %s310_s21, 128  ;;  %s1442_s4 = smov [#allocation2]  }
  0x57   : > { %p1315_p1 = scmp.ne.s32.totalorder %s310_s21, %s1314_s22  ;;  %s1319_s5 = sshll.u32 %s1442_s4, 4  ;;  %s1320_s5 = int_to_ptr.vmem [resolvable:$false] %s1319_s5 }
  0x58   : > { %s1321_s25 = scalar_lea.vmem %s1320_s5, 256  ;;  %p1322_p9 = scmp.lt.s32.totalorder %s310_s21, %s1320_s5 }
  0x59   : > { %p1317_p2 = pnand %p1315_p1, %p1303_p7  ;;  %p1323_p6 = scmp.lt.s32.totalorder %s1321_s25, %s1314_s22 }
  0x5b   : > { %p1318_p3 = pneg %p1317_p2  ;;  %p1324_p4 = por %p1323_p6, %p1322_p9 }
  0x5d   : > { %p1325_p8 = pnand %p1324_p4, %p1318_p3 }
  0x5f   : > { %1328 = shalt.err (!%p1325_p8)
}
  0x60   : > { %1162 = dma.hbm_to_vmem [thread:$0]  (!%p1600_p11), %s1598_s17, 128, %s310_s21, %s299_s23  }
  0x61   : > { %s1128_s2 = smul.u32 24, %s1591_s10  ;;  %s1801_s20 = sand.u32 1, %s1433_s30  }
  0x62   : > { %s1129_s26 = smul.u32 384, %s1433_s30  ;;  %s317_s25 = scalar_lea.sflag [#allocation6], %s1801_s20 }
  0x63   : > { %s320_s5 = scalar_lea.vmem [#allocation5], %s1128_s2  ;;  %s1334_s21 = scalar_lea.hbm %s1774_s1, 768 }
  0x64   : > { %s1631_s4 = scalar_lea.hbm %s1774_s1, %s1129_s26  ;;  %s328_s22 = sshll.u32 %s320_s5, 4  ;;  %s329_s22 = int_to_ptr.vmem [resolvable:$true] %s328_s22 }
  0x65   : > { %s1329_s0 = scalar_lea.hbm %s1631_s4, 384  ;;  %p1335_p13 = scmp.lt.s32.totalorder %s1631_s4, %s1774_s1 }
  0x66   : > { %p1330_p4 = scmp.ne.s32.totalorder %s1631_s4, %s1329_s0  ;;  %p1336_p12 = scmp.lt.s32.totalorder %s1334_s21, %s1329_s0 }
  0x68   : > { %p1332_p8 = pnand %p1330_p4, %p1303_p7  ;;  %p1337_p0 = por %p1336_p12, %p1335_p13 }
  0x6a   : > { %p1333_p6 = pneg %p1332_p8 }
  0x6c   : > { %p1338_p5 = pnand %p1337_p0, %p1333_p6 }
  0x6e   : > { %1341 = shalt.err (!%p1338_p5)
}
  0x6f   : > { %s1342_s2 = scalar_lea.vmem %s329_s22, 384  ;;  %s1443_s14 = smov [#allocation5]  }
  0x70   : > { %p1343_p10 = scmp.ne.s32.totalorder %s329_s22, %s1342_s2  ;;  %s1347_s15 = sshll.u32 %s1443_s14, 4  ;;  %s1348_s15 = int_to_ptr.vmem [resolvable:$false] %s1347_s15 }
  0x71   : > { %s1349_s5 = scalar_lea.vmem %s1348_s15, 768  ;;  %p1350_p3 = scmp.lt.s32.totalorder %s329_s22, %s1348_s15 }
  0x72   : > { %p1345_p1 = pnand %p1343_p10, %p1303_p7  ;;  %p1351_p9 = scmp.lt.s32.totalorder %s1349_s5, %s1342_s2 }
  0x74   : > { %p1346_p2 = pneg %p1345_p1  ;;  %p1352_p4 = por %p1351_p9, %p1350_p3 }
  0x76   : > { %p1353_p8 = pnand %p1352_p4, %p1346_p2 }
  0x78   : > { %1356 = shalt.err (!%p1353_p8)
}
  0x79   : > { %1165 = dma.hbm_to_vmem [thread:$0]  (!%p1600_p11), %s1631_s4, 384, %s329_s22, %s317_s25  }
  0x7a   : > { %p1802_p6 = scmp.ne.s32.totalorder %s1792_s13, 0 }
  0x7b   : > { %s1656_s0 = sand.u32 (!%p1802_p6), 1, %s1425_s28   ;;  %p1803_p7 = scmp.ne.s32.totalorder (!%p1802_p6), %s1790_s11, 0 }
  0x7c   : > { %337 = sbr.rel (%p1802_p6) target bundleno = 618 (0x26a), region = 52  ;;  %s1013_s20 = sshll.u32 (!%p1802_p6), %s1656_s0, 3 }
  0x7d   : > { %s340_s10 = scalar_lea.sflag (!%p1802_p6), [#allocation3], %s1656_s0  ;;  %s1662_s17 = scalar_lea.vmem (!%p1802_p6), [#allocation2], %s1013_s20 }
  0x81   : > { %1400 = dma.done.wait (%p1803_p7), %s340_s10, 128  }
  0x82   : > { %1402 = vsyncadd (%p1803_p7), %s340_s10, 4294967168  ;;  %s348_s13 = sand.u32 1, %s1513_s9   ;;  %s1130_s18 = smul.u32 24, %s1656_s0 }
  0x83   : > { %s349_s4 = scalar_lea.sflag [#allocation6], %s348_s13 }
  0x84   : > { %s1670_s22 = scalar_lea.vmem [#allocation5], %s1130_s18 }
  0x85   : > { %1404 = dma.done.wait (%p1803_p7), %s349_s4, 384  }
  0x86   : > { %1406 = vsyncadd (%p1803_p7), %s349_s4, 4294966912  ;;  %p1804_p11 = scmp.eq.s32.totalorder %s1513_s9, 0 }
  0x88   : > { %1408 = dma.done.wait (%p1804_p11), [#allocation6], 12288   ;;  %p1805_p13 = pmov %p1804_p11 }
  0x89   : > { %p1806_p12 = pmov %p1804_p11 }
  0x8a   : > { %1410 = vsyncadd (%p1805_p13), [#allocation6], 4294955008 }
  0x8b   : > { %1412 = dma.done.wait (%p1806_p12), [#allocation9], 4096   ;;  %p1807_p0 = pmov %p1804_p11 }
  0x8c   : > { %v1444_v0 = vmov 0.0   ;;  %v437_v1 = vld [vmem:[#allocation7 + $0xf8] sm:$0xff]  ;;  %v436_v2 = vld [vmem:[#allocation7 + $0xf0] sm:$0xff]  ;;  %v435_v3 = vld [vmem:[#allocation7 + $0xe8] sm:$0xff]  ;;  %vm1445_vm0 = vmmov 0   ;;  %s1021_s14 = sshll.u32 %s1513_s9, 7 }
  0x8d   : > { %1414 = vsyncadd (%p1807_p0), [#allocation9], 4294963200  ;;  %649 = vmatprep.mubr.f32.mxu1 %v1444_v0  ;;  %514 = vmatprep.subr.mxu0 %v437_v1  ;;  %v434_v4 = vld [vmem:[#allocation7 + $0xe0] sm:$0xff]  ;;  %v433_v5 = vld [vmem:[#allocation7 + $0xd8] sm:$0xff]  ;;  %s401_s15 = scalar_lea.vmem [#allocation11], %s1013_s20  ;;  %s880_s13 = scalar_lea.hbm %s1781_s8, %s1021_s14 }
  0x8e   : > { %515 = vmatpush1.msra.mxu0 %v436_v2  ;;  %v432_v6 = vld [vmem:[#allocation7 + $0xd0] sm:$0xff]  ;;  %v431_v7 = vld [vmem:[#allocation7 + $0xc8] sm:$0xff]  ;;  %v430_v8 = vld [vmem:[#allocation7 + $0xc0] sm:$0xff]  ;;  %s882_s5 = sshll.u32 %s401_s15, 4  ;;  %s869_s18 = scalar_lea.sflag [#allocation4], %s1656_s0  ;;  %s883_s5 = int_to_ptr.vmem [resolvable:$true] %s882_s5 }
  0x8f   : > { %516 = vmatprep.subr.mxu0 %v435_v3  ;;  %v429_v9 = vld [vmem:[#allocation7 + $0xb8] sm:$0xff]  ;;  %v428_v10 = vld [vmem:[#allocation7 + $0xb0] sm:$0xff]  ;;  %v427_v11 = vld [vmem:[#allocation7 + $0xa8] sm:$0xff]  ;;  %s1357_s4 = scalar_lea.vmem %s883_s5, 128  ;;  %p1808_p10 = scmp.ne.s32.totalorder %s1798_s24, 0 }
  0x90   : > { %517 = vmatpush1.msra.mxu0 %v434_v4  ;;  %v426_v12 = vld [vmem:[#allocation7 + $0xa0] sm:$0xff]  ;;  %v425_v13 = vld [vmem:[#allocation7 + $0x98] sm:$0xff]  ;;  %v424_v14 = vld [vmem:[#allocation7 + $0x90] sm:$0xff]  ;;  %p1358_p5 = scmp.ne.s32.totalorder %s883_s5, %s1357_s4 }
  0x91   : > { %518 = vmatprep.subr.mxu0 %v433_v5  ;;  %v501_v15 = vld [vmem:[#allocation7 + $0x2f8] sm:$0xff]  ;;  %v500_v16 = vld [vmem:[#allocation7 + $0x2f0] sm:$0xff]  ;;  %v423_v17 = vld [vmem:[#allocation7 + $0x88] sm:$0xff] }
  0x92   : > { %519 = vmatpush1.msra.mxu0 %v432_v6  ;;  %585 = vmatprep.subr.mxu1 %v501_v15  ;;  %v499_v18 = vld [vmem:[#allocation7 + $0x2e8] sm:$0xff]  ;;  %v422_v19 = vld [vmem:[#allocation7 + $0x80] sm:$0xff]  ;;  %v497_v21 = vld [vmem:[#allocation7 + $0x2d8] sm:$0xff]  ;;  %p1359_p1 = pnand %p1358_p5, %p1808_p10 }
  0x93   : > { %520 = vmatprep.subr.mxu0 %v431_v7  ;;  %586 = vmatpush1.msra.mxu1 %v500_v16  ;;  %v498_v20 = vld [vmem:[#allocation7 + $0x2e0] sm:$0xff]  ;;  %v421_v22 = vld [vmem:[#allocation7 + $0x78] sm:$0xff]  ;;  %v496_v23 = vld [vmem:[#allocation7 + $0x2d0] sm:$0xff] }
  0x94   : > { %521 = vmatpush1.msra.mxu0 %v430_v8  ;;  %587 = vmatprep.subr.mxu1 %v499_v18  ;;  %v420_v24 = vld [vmem:[#allocation7 + $0x70] sm:$0xff]  ;;  %v495_v25 = vld [vmem:[#allocation7 + $0x2c8] sm:$0xff]  ;;  %v494_v27 = vld [vmem:[#allocation7 + $0x2c0] sm:$0xff]  ;;  %p1360_p2 = pneg %p1359_p1 }
  0x95   : > { %522 = vmatprep.subr.mxu0 %v429_v9  ;;  %588 = vmatpush1.msra.mxu1 %v498_v20  ;;  %v419_v26 = vld [vmem:[#allocation7 + $0x68] sm:$0xff]  ;;  %v418_v28 = vld [vmem:[#allocation7 + $0x60] sm:$0xff]  ;;  %v493_v29 = vld [vmem:[#allocation7 + $0x2b8] sm:$0xff] }
  0x96   : > { %523 = vmatpush1.msra.mxu0 %v428_v10  ;;  %589 = vmatprep.subr.mxu1 %v497_v21  ;;  %v417_v30 = vld [vmem:[#allocation7 + $0x58] sm:$0xff]  ;;  %v492_v31 = vld [vmem:[#allocation7 + $0x2b0] sm:$0xff]  ;;  %v491_v33 = vld [vmem:[#allocation7 + $0x2a8] sm:$0xff] }
  0x97   : > { %524 = vmatprep.subr.mxu0 %v427_v11  ;;  %590 = vmatpush1.msra.mxu1 %v496_v23  ;;  %v416_v32 = vld [vmem:[#allocation7 + $0x50] sm:$0xff]  ;;  %v415_v34 = vld [vmem:[#allocation7 + $0x48] sm:$0xff]  ;;  %v490_v35 = vld [vmem:[#allocation7 + $0x2a0] sm:$0xff] }
  0x98   : > { %525 = vmatpush1.msra.mxu0 %v426_v12  ;;  %591 = vmatprep.subr.mxu1 %v495_v25  ;;  %v414_v36 = vld [vmem:[#allocation7 + $0x40] sm:$0xff]  ;;  %v489_v37 = vld [vmem:[#allocation7 + $0x298] sm:$0xff]  ;;  %v488_v39 = vld [vmem:[#allocation7 + $0x290] sm:$0xff] }
  0x99   : > { %526 = vmatprep.subr.mxu0 %v425_v13  ;;  %592 = vmatpush1.msra.mxu1 %v494_v27  ;;  %v413_v38 = vld [vmem:[#allocation7 + $0x38] sm:$0xff]  ;;  %v412_v40 = vld [vmem:[#allocation7 + $0x30] sm:$0xff]  ;;  %v487_v41 = vld [vmem:[#allocation7 + $0x288] sm:$0xff] }
  0x9a   : > { %527 = vmatpush1.msra.mxu0 %v424_v14  ;;  %593 = vmatprep.subr.mxu1 %v493_v29  ;;  %v411_v42 = vld [vmem:[#allocation7 + $0x28] sm:$0xff]  ;;  %v486_v43 = vld [vmem:[#allocation7 + $0x280] sm:$0xff]  ;;  %v485_v45 = vld [vmem:[#allocation7 + $0x278] sm:$0xff] }
  0x9b   : > { %528 = vmatprep.subr.mxu0 %v423_v17  ;;  %594 = vmatpush1.msra.mxu1 %v492_v31  ;;  %v410_v44 = vld [vmem:[#allocation7 + $0x20] sm:$0xff]  ;;  %v409_v46 = vld [vmem:[#allocation7 + $0x18] sm:$0xff]  ;;  %v484_v47 = vld [vmem:[#allocation7 + $0x270] sm:$0xff] }
  0x9c   : > { %529 = vmatpush1.msra.mxu0 %v422_v19  ;;  %595 = vmatprep.subr.mxu1 %v491_v33  ;;  %v408_v48 = vld [vmem:[#allocation7 + $0x10] sm:$0xff]  ;;  %v483_v49 = vld [vmem:[#allocation7 + $0x268] sm:$0xff]  ;;  %v482_v51 = vld [vmem:[#allocation7 + $0x260] sm:$0xff] }
  0x9d   : > { %530 = vmatprep.subr.mxu0 %v421_v22  ;;  %596 = vmatpush1.msra.mxu1 %v490_v35  ;;  %v407_v50 = vld [vmem:[#allocation7 + $0x8] sm:$0xff]  ;;  %v406_v52 = vld [vmem:[#allocation7] sm:$0xff]  ;;  %v481_v53 = vld [vmem:[#allocation7 + $0x258] sm:$0xff] }
  0x9e   : > { %531 = vmatpush1.msra.mxu0 %v420_v24  ;;  %597 = vmatprep.subr.mxu1 %v489_v37  ;;  %v469_v54 = vld [vmem:[#allocation7 + $0x1f8] sm:$0xff]  ;;  %v480_v55 = vld [vmem:[#allocation7 + $0x250] sm:$0xff]  ;;  %v479_v57 = vld [vmem:[#allocation7 + $0x248] sm:$0xff] }
  0x9f   : > { %532 = vmatprep.subr.mxu0 %v419_v26  ;;  %598 = vmatpush1.msra.mxu1 %v488_v39  ;;  %v468_v56 = vld [vmem:[#allocation7 + $0x1f0] sm:$0xff]  ;;  %v467_v58 = vld [vmem:[#allocation7 + $0x1e8] sm:$0xff]  ;;  %v478_v59 = vld [vmem:[#allocation7 + $0x240] sm:$0xff] }
  0xa0   : > { %533 = vmatpush1.msra.mxu0 %v418_v28  ;;  %599 = vmatprep.subr.mxu1 %v487_v41  ;;  %v466_v60 = vld [vmem:[#allocation7 + $0x1e0] sm:$0xff]  ;;  %v477_v61 = vld [vmem:[#allocation7 + $0x238] sm:$0xff]  ;;  %v476_v63 = vld [vmem:[#allocation7 + $0x230] sm:$0xff] }
  0xa1   : > { %534 = vmatprep.subr.mxu0 %v417_v30  ;;  %600 = vmatpush1.msra.mxu1 %v486_v43  ;;  %v465_v62 = vld [vmem:[#allocation7 + $0x1d8] sm:$0xff]  ;;  %v464_v1 = vld [vmem:[#allocation7 + $0x1d0] sm:$0xff]  ;;  %v475_v2 = vld [vmem:[#allocation7 + $0x228] sm:$0xff] }
  0xa2   : > { %535 = vmatpush1.msra.mxu0 %v416_v32  ;;  %601 = vmatprep.subr.mxu1 %v485_v45  ;;  %v463_v3 = vld [vmem:[#allocation7 + $0x1c8] sm:$0xff]  ;;  %v474_v4 = vld [vmem:[#allocation7 + $0x220] sm:$0xff]  ;;  %v473_v6 = vld [vmem:[#allocation7 + $0x218] sm:$0xff] }
  0xa3   : > { %536 = vmatprep.subr.mxu0 %v415_v34  ;;  %602 = vmatpush1.msra.mxu1 %v484_v47  ;;  %v462_v5 = vld [vmem:[#allocation7 + $0x1c0] sm:$0xff]  ;;  %v461_v7 = vld [vmem:[#allocation7 + $0x1b8] sm:$0xff]  ;;  %v472_v8 = vld [vmem:[#allocation7 + $0x210] sm:$0xff] }
  0xa4   : > { %537 = vmatpush1.msra.mxu0 %v414_v36  ;;  %603 = vmatprep.subr.mxu1 %v483_v49  ;;  %v460_v9 = vld [vmem:[#allocation7 + $0x1b0] sm:$0xff]  ;;  %v471_v10 = vld [vmem:[#allocation7 + $0x208] sm:$0xff]  ;;  %v458_v13 = vld [vmem:[#allocation7 + $0x1a0] sm:$0xff] }
  0xa5   : > { %538 = vmatprep.subr.mxu0 %v413_v38  ;;  %604 = vmatpush1.msra.mxu1 %v482_v51  ;;  %v459_v11 = vld [vmem:[#allocation7 + $0x1a8] sm:$0xff]  ;;  %v404_v12 = vld [vmem:[%s1670_s22 + $0x8] sm:$0xff]  ;;  %v470_v14 = vld [vmem:[#allocation7 + $0x200] sm:$0xff] }
  0xa6   : > { %539 = vmatpush1.msra.mxu0 %v412_v40  ;;  %605 = vmatprep.subr.mxu1 %v481_v53  ;;  %v457_v15 = vld [vmem:[#allocation7 + $0x198] sm:$0xff]  ;;  %v456_v17 = vld [vmem:[#allocation7 + $0x190] sm:$0xff]  ;;  %v1688_v18 = vld [vmem:[%s1662_s17] sm:$0xff] }
  0xa7   : > { %540 = vmatprep.subr.mxu0 %v411_v42  ;;  %606 = vmatpush1.msra.mxu1 %v480_v55  ;;  %v405_v16 = vld [vmem:[%s1670_s22 + $0x10] sm:$0xff]  ;;  %v455_v19 = vld [vmem:[#allocation7 + $0x188] sm:$0xff]  ;;  %v452_v23 = vld [vmem:[#allocation7 + $0x170] sm:$0xff] }
  0xa8   : > { %541 = vmatpush1.msra.mxu0 %v410_v44  ;;  %607 = vmatprep.subr.mxu1 %v479_v57  ;;  %v454_v20 = vld [vmem:[#allocation7 + $0x180] sm:$0xff]  ;;  %v673_v21 = vld [vmem:[#allocation8 + $0x78] sm:$0xff]  ;;  %v672_v24 = vld [vmem:[#allocation8 + $0x70] sm:$0xff] }
  0xa9   : > { %542 = vmatprep.subr.mxu0 %v409_v46  ;;  %608 = vmatpush1.msra.mxu1 %v478_v59  ;;  %v453_v22 = vld [vmem:[#allocation7 + $0x178] sm:$0xff]  ;;  %v451_v25 = vld [vmem:[#allocation7 + $0x168] sm:$0xff]  ;;  %v450_v26 = vld [vmem:[#allocation7 + $0x160] sm:$0xff] }
  0xaa   : > { %543 = vmatpush1.msra.mxu0 %v408_v48  ;;  %609 = vmatprep.subr.mxu1 %v477_v61  ;;  %v671_v27 = vld [vmem:[#allocation8 + $0x68] sm:$0xff]  ;;  %v449_v28 = vld [vmem:[#allocation7 + $0x158] sm:$0xff]  ;;  %v448_v29 = vld [vmem:[#allocation7 + $0x150] sm:$0xff] }
  0xab   : > { %544 = vmatprep.subr.mxu0 %v407_v50  ;;  %610 = vmatpush1.msra.mxu1 %v476_v63  ;;  %v670_v30 = vld [vmem:[#allocation8 + $0x60] sm:$0xff]  ;;  %v447_v31 = vld [vmem:[#allocation7 + $0x148] sm:$0xff]  ;;  %v669_v33 = vld [vmem:[#allocation8 + $0x58] sm:$0xff] }
  0xac   : > { %545 = vmatpush1.msra.mxu0 %v406_v52  ;;  %611 = vmatprep.subr.mxu1 %v475_v2  ;;  %v446_v32 = vld [vmem:[#allocation7 + $0x140] sm:$0xff]  ;;  %v445_v34 = vld [vmem:[#allocation7 + $0x138] sm:$0xff]  ;;  %v444_v35 = vld [vmem:[#allocation7 + $0x130] sm:$0xff] }
  0xad   : > { %546 = vmatprep.subr.mxu0 %v469_v54  ;;  %612 = vmatpush1.msra.mxu1 %v474_v4  ;;  %v668_v36 = vld [vmem:[#allocation8 + $0x50] sm:$0xff]  ;;  %v443_v37 = vld [vmem:[#allocation7 + $0x128] sm:$0xff]  ;;  %v442_v38 = vld [vmem:[#allocation7 + $0x120] sm:$0xff] }
  0xae   : > { %547 = vmatpush2.msra.mxu0 %v468_v56  ;;  %613 = vmatprep.subr.mxu1 %v473_v6  ;;  %v667_v39 = vld [vmem:[#allocation8 + $0x48] sm:$0xff]  ;;  %v441_v40 = vld [vmem:[#allocation7 + $0x118] sm:$0xff]  ;;  %v440_v41 = vld [vmem:[#allocation7 + $0x110] sm:$0xff] }
  0xaf   : > { %548 = vmatprep.subr.mxu0 %v467_v58  ;;  %614 = vmatpush1.msra.mxu1 %v472_v8  ;;  %v666_v42 = vld [vmem:[#allocation8 + $0x40] sm:$0xff]  ;;  %v439_v43 = vld [vmem:[#allocation7 + $0x108] sm:$0xff]  ;;  %v665_v45 = vld [vmem:[#allocation8 + $0x38] sm:$0xff] }
  0xb0   : > { %549 = vmatpush2.msra.mxu0 %v466_v60  ;;  %615 = vmatprep.subr.mxu1 %v471_v10  ;;  %v438_v44 = vld [vmem:[#allocation7 + $0x100] sm:$0xff]  ;;  %v403_v46 = vld [vmem:[%s1670_s22] sm:$0xff]  ;;  %v766_v47 = vld [vmem:[#allocation10 + $0x78] sm:$0xff]  ;;  %s1446_s22 = smov [#allocation11]  }
  0xb1   : > { %550 = vmatprep.subr.mxu0 %v465_v62  ;;  %578 = vmatprep.mubr.f32.mxu0 %v404_v12  ;;  %v664_v48 = vld [vmem:[#allocation8 + $0x30] sm:$0xff]  ;;  %v663_v50 = vld [vmem:[#allocation8 + $0x28] sm:$0xff]  ;;  %v662_v52 = vld [vmem:[#allocation8 + $0x20] sm:$0xff]  ;;  %s1361_s9 = sshll.u32 %s1446_s22, 4  ;;  %s1362_s9 = int_to_ptr.vmem [resolvable:$false] %s1361_s9 }
  0xb2   : > { %551 = vmatpush2.msra.mxu0 %v464_v1  ;;  %616 = vmatpush1.msra.mxu1 %v470_v14  ;;  %v765_v49 = vld [vmem:[#allocation10 + $0x70] sm:$0xff]  ;;  %v764_v51 = vld [vmem:[#allocation10 + $0x68] sm:$0xff]  ;;  %v763_v53 = vld [vmem:[#allocation10 + $0x60] sm:$0xff]  ;;  %s1363_s20 = scalar_lea.vmem %s1362_s9, 256  ;;  %p1364_p3 = scmp.lt.s32.totalorder %s883_s5, %s1362_s9 }
  0xb3   : > { %552 = vmatprep.subr.mxu0 %v463_v3  ;;  %650 = vmatmul.mubr.f32.vlgmr.msra.gmra.mxu1 %v405_v16  ;;  %v762_v54 = vld [vmem:[#allocation10 + $0x58] sm:$0xff]  ;;  %v761_v55 = vld [vmem:[#allocation10 + $0x50] sm:$0xff]  ;;  %v760_v56 = vld [vmem:[#allocation10 + $0x48] sm:$0xff]  ;;  %p1365_p9 = scmp.lt.s32.totalorder %s1363_s20, %s1357_s4 }
  0xb4   : > { %553 = vmatpush2.msra.mxu0 %v462_v5  ;;  %844 = vadd.xlane.f32.xlu0 %v1688_v18  ;;  %v759_v57 = vld [vmem:[#allocation10 + $0x40] sm:$0xff]  ;;  %v758_v58 = vld [vmem:[#allocation10 + $0x38] sm:$0xff]  ;;  %v757_v59 = vld [vmem:[#allocation10 + $0x30] sm:$0xff] }
  0xb5   : > { %554 = vmatprep.subr.mxu0 %v461_v7  ;;  %1058 = vmatprep.subr.mxu1 %v1444_v0  ;;  %v756_v60 = vld [vmem:[#allocation10 + $0x28] sm:$0xff]  ;;  %v661_v61 = vld [vmem:[#allocation8 + $0x18] sm:$0xff]  ;;  %v755_v62 = vld [vmem:[#allocation10 + $0x20] sm:$0xff]  ;;  %p1366_p4 = por %p1365_p9, %p1364_p3 }
  0xb6   : > { %555 = vmatpush2.msra.mxu0 %v460_v9  ;;  %1059 = vmatpush3.msra.mxu1 %v673_v21  ;;  %v660_v63 = vld [vmem:[#allocation8 + $0x10] sm:$0xff]  ;;  %v754_v1 = vld [vmem:[#allocation10 + $0x18] sm:$0xff]  ;;  %v659_v2 = vld [vmem:[#allocation8 + $0x8] sm:$0xff] }
  0xb7   : > { %556 = vmatprep.subr.mxu0 %v459_v11  ;;  %1060 = vmatprep.subr.mxu1 %v1444_v0  ;;  %v753_v3 = vld [vmem:[#allocation10 + $0x10] sm:$0xff]  ;;  %v658_v4 = vld [vmem:[#allocation8] sm:$0xff]  ;;  %v752_v5 = vld [vmem:[#allocation10 + $0x8] sm:$0xff]  ;;  %v504_v11 = vlaneseq  ;;  %p1367_p8 = pnand %p1366_p4, %p1360_p2 }
  0xb8   : > { %557 = vmatpush2.msra.mxu0 %v458_v13  ;;  %1061 = vmatpush3.msra.mxu1 %v672_v24  ;;  %v751_v6 = vld [vmem:[#allocation10] sm:$0xff] }
  0xb9   : > { %558 = vmatprep.subr.mxu0 %v457_v15  ;;  %1062 = vmatprep.subr.mxu1 %v1444_v0  ;;  %v505_v12 = vshrl.u32 %v504_v11, 7  ;;  %v502_v14 = vld [vmem:[%s1776_s3] sm:$0x3] }
  0xba   : > { %559 = vmatpush2.msra.mxu0 %v456_v17  ;;  %1063 = vmatpush3.msra.mxu1 %v671_v27 }
  0xbb   : > { %560 = vmatprep.subr.mxu0 %v455_v19  ;;  %1064 = vmatprep.subr.mxu1 %v1444_v0  ;;  %v506_v13 = vsub.s32 0, %v505_v12  ;;  %v510_v15 = vsub.s32 1, %v505_v12 }
  0xbc   : > { %561 = vmatpush2.msra.mxu0 %v454_v20  ;;  %1065 = vmatpush3.msra.mxu1 %v670_v30 }
  0xbd   : > { %562 = vmatprep.subr.mxu0 %v453_v22  ;;  %1066 = vmatprep.subr.mxu1 %v1444_v0  ;;  %v507_v16 = vrot.slane %v502_v14, %v506_v13  ;;  %v511_v17 = vrot.slane %v502_v14, %v510_v15 }
  0xbe   : > { %563 = vmatpush2.msra.mxu0 %v452_v23  ;;  %1067 = vmatpush3.msra.mxu1 %v669_v33 }
  0xbf   : > { %564 = vmatprep.subr.mxu0 %v451_v25  ;;  %1068 = vmatprep.subr.mxu1 %v1444_v0 }
  0xc0   : > { %565 = vmatpush2.msra.mxu0 %v450_v26  ;;  %1069 = vmatpush3.msra.mxu1 %v668_v36 }
  0xc1   : > { %566 = vmatprep.subr.mxu0 %v449_v28  ;;  %1070 = vmatprep.subr.mxu1 %v1444_v0 }
  0xc2   : > { %567 = vmatpush2.msra.mxu0 %v448_v29  ;;  %1071 = vmatpush3.msra.mxu1 %v667_v39  ;;  %v1019_v39 = vld [vmem:[%s1780_s7] ss:$0 sm:$0xff] }
  0xc3   : > { %568 = vmatprep.subr.mxu0 %v447_v31  ;;  %1072 = vmatprep.subr.mxu1 %v1444_v0 }
  0xc4   : > { %569 = vmatpush2.msra.mxu0 %v446_v32  ;;  %1073 = vmatpush3.msra.mxu1 %v666_v42 }
  0xc5   : > { %570 = vmatprep.subr.mxu0 %v445_v34  ;;  %1074 = vmatprep.subr.mxu1 %v1444_v0 }
  0xc6   : > { %571 = vmatpush2.msra.mxu0 %v444_v35  ;;  %1075 = vmatpush3.msra.mxu1 %v665_v45  ;;  %v1018_v35 = vld [vmem:[%s1779_s6] ss:$0 sm:$0xff] }
  0xc7   : > { %572 = vmatprep.subr.mxu0 %v443_v37  ;;  %1076 = vmatprep.subr.mxu1 %v1444_v0 }
  0xc8   : > { %573 = vmatpush2.msra.mxu0 %v442_v38  ;;  %1077 = vmatpush3.msra.mxu1 %v664_v48 }
  0xc9   : > { %574 = vmatprep.subr.mxu0 %v441_v40  ;;  %1078 = vmatprep.subr.mxu1 %v1444_v0 }
  0xca   : > { %575 = vmatpush2.msra.mxu0 %v440_v41  ;;  %1079 = vmatpush3.msra.mxu1 %v663_v50 }
  0xcb   : > { %576 = vmatprep.subr.mxu0 %v439_v43  ;;  %1080 = vmatprep.subr.mxu1 %v1444_v0 }
  0xcc   : > { %577 = vmatpush2.msra.mxu0 %v438_v44  ;;  %1081 = vmatpush3.msra.mxu1 %v662_v52 }
  0xcd   : > { %579 = vmatmul.mubr.f32.vlgmr.msra.gmra.mxu0 %v403_v46  ;;  %1093 = vmatprep.subr.mxu0 %v1444_v0 }
  0xce   : > { %1094 = vmatpush3.msra.mxu0 %v766_v47  ;;  %1082 = vmatprep.subr.mxu1 %v1444_v0 }
  0xcf   : > { %1095 = vmatprep.subr.mxu0 %v1444_v0  ;;  %1083 = vmatpush3.msra.mxu1 %v661_v61 }
  0xd0   : > { %1096 = vmatpush3.msra.mxu0 %v765_v49  ;;  %1084 = vmatprep.subr.mxu1 %v1444_v0 }
  0xd1   : > { %1097 = vmatprep.subr.mxu0 %v1444_v0  ;;  %1085 = vmatpush3.msra.mxu1 %v660_v63 }
  0xd2   : > { %1098 = vmatpush3.msra.mxu0 %v764_v51  ;;  %1086 = vmatprep.subr.mxu1 %v1444_v0 }
  0xd3   : > { %1099 = vmatprep.subr.mxu0 %v1444_v0  ;;  %1087 = vmatpush3.msra.mxu1 %v659_v2 }
  0xd4   : > { %1100 = vmatpush3.msra.mxu0 %v763_v53  ;;  %1088 = vmatprep.subr.mxu1 %v1444_v0 }
  0xd5   : > { %1101 = vmatprep.subr.mxu0 %v1444_v0  ;;  %1089 = vmatpush3.msra.mxu1 %v658_v4 }
  0xd6   : > { %1102 = vmatpush3.msra.mxu0 %v762_v54  ;;  %1090 = vmatprep.mubr.msk.f32.mxu1 %vm1445_vm0, %v1444_v0 }
  0xd7   : > { %1103 = vmatprep.subr.mxu0 %v1444_v0  ;;  %1125 = vmatprep.mubr.msk.f32.mxu0 %vm1445_vm0, %v1444_v0 }
  0xd8   : > { %1104 = vmatpush3.msra.mxu0 %v761_v55 }
  0xd9   : > { %1105 = vmatprep.subr.mxu0 %v1444_v0 }
  0xda   : > { %1106 = vmatpush3.msra.mxu0 %v760_v56 }
  0xdb   : > { %1107 = vmatprep.subr.mxu0 %v1444_v0 }
  0xdc   : > { %1108 = vmatpush3.msra.mxu0 %v759_v57 }
  0xdd   : > { %1109 = vmatprep.subr.mxu0 %v1444_v0 }
  0xde   : > { %1110 = vmatpush3.msra.mxu0 %v758_v58 }
  0xdf   : > { %1111 = vmatprep.subr.mxu0 %v1444_v0 }
  0xe0   : > { %1112 = vmatpush3.msra.mxu0 %v757_v59 }
  0xe1   : > { %1113 = vmatprep.subr.mxu0 %v1444_v0 }
  0xe2   : > { %1114 = vmatpush3.msra.mxu0 %v756_v60 }
  0xe3   : > { %1115 = vmatprep.subr.mxu0 %v1444_v0 }
  0xe4   : > { %1116 = vmatpush3.msra.mxu0 %v755_v62 }
  0xe5   : > { %1117 = vmatprep.subr.mxu0 %v1444_v0 }
  0xe6   : > { %1118 = vmatpush3.msra.mxu0 %v754_v1 }
  0xe7   : > { %1119 = vmatprep.subr.mxu0 %v1444_v0 }
  0xe8   : > { %1120 = vmatpush3.msra.mxu0 %v753_v3 }
  0xe9   : > { %1121 = vmatprep.subr.mxu0 %v1444_v0 }
  0xea   : > { %1122 = vmatpush3.msra.mxu0 %v752_v5 }
  0xeb   : > { %1123 = vmatprep.subr.mxu0 %v1444_v0 }
  0xec   : > { %1124 = vmatpush3.msra.mxu0 %v751_v6 }
 0x13d   : > { %v845_v7 = vpop.xlane.xlu0 %844 }
 0x13e   : > { %v847_v8 = vmul.f32 0.0078125, %v845_v7 }
 0x140   : > { %v848_v9 = vsub.f32 %v1688_v18, %v847_v8 }
 0x142   : > { %v849_v10 = vmul.f32 %v848_v9, %v848_v9 }
 0x144   : > { %850 = vadd.xlane.f32.xlu0 %v849_v10 }
 0x173   : > { %v651_v20 = vpop.f32.mrf.mxu1 }
 0x175   : > { %v653_v24 = vpop.f32.mrf.mxu1 }
 0x18d   : > { %v580_v19 = vpop.f32.mrf.mxu0 }
 0x18e   : > { %v581_v0 = vadd.f32 %v580_v19, %v507_v16 }
 0x18f   : > { %v582_v21 = vpop.f32.mrf.mxu0 }
 0x190   : > { %v652_v22 = vadd.f32 %v651_v20, %v581_v0  ;;  %v583_v23 = vadd.f32 %v582_v21, %v511_v17 }
 0x192   : > { %v656_v18 = vmax.f32 %v652_v22, 0.0  ;;  %v654_v25 = vadd.f32 %v653_v24, %v583_v23 }
 0x194   : > { %v657_v26 = vmax.f32 %v654_v25, 0.0  ;;  %1091 = vmatmul.mubr.f32.vlgmr.msra.gmra.mxu1 %v656_v18 }
 0x196   : > { %1126 = vmatmul.mubr.f32.vlgmr.msra.gmra.mxu0 %v657_v26 }
 0x1cd   : > { %v851_v27 = vpop.xlane.xlu0 %850 }
 0x1ce   : > { %v853_v28 = vmul.f32 0.007874016, %v851_v27 }
 0x1d0   : > { %1219 = vrsqrt.f32 %v853_v28  ;;  %vm856_vm1 = vcmp.eq.f32.partialorder %v853_v28, inf  ;;  %v859_v31 = vand.u32 2147483648, %v853_v28  ;;  %vm858_vm2 = vcmp.eq.f32.partialorder %v853_v28, 0.0 }
 0x1dd   : > { %v1220_v29 = vpop.eup %1219 }
 0x1de   : > { %v855_v30 = vmul.f32 %v1220_v29, %v853_v28 }
 0x1e0   : > { %v857_v32 = vsel %vm856_vm1, %v853_v28, %v855_v30 }
 0x1e1   : > { %v860_v33 = vsel %vm858_vm2, %v859_v31, %v857_v32 }
 0x1e2   : > { %v861_v34 = vadd.f32 1e-06, %v860_v33 }
 0x1e4   : > { %1221 = vrcp.f32 %v861_v34 }
 0x1f1   : > { %v1222_v42 = vpop.eup %1221 }
 0x254   : > { %v747_v36 = vpop.f32.mrf.mxu1 }
 0x255   : > { %v748_v37 = vadd.f32 %v1018_v35, %v747_v36 }
 0x256   : > { %v1092_v38 = vpop.f32.mrf.mxu1  ;;  %v840_v40 = vpop.f32.mrf.mxu0 }
 0x257   : > { %v864_v41 = vmul.f32 %v848_v9, %v748_v37  ;;  %v841_v44 = vadd.f32 %v1019_v39, %v840_v40 }
 0x258   : > { %v1127_v43 = vpop.f32.mrf.mxu0 }
 0x259   : > { %v865_v45 = vmul.f32 %v1222_v42, %v864_v41 }
 0x25b   : > { %v866_v46 = vadd.f32 %v865_v45, %v841_v44 }
 0x25d   : > { %867 = vst [vmem:[%s401_s15] sm:$0xff] %v866_v46 }
 0x25e   : > { %1370 = shalt.err (!%p1367_p8)
}
 0x25f   : > { %s1371_s11 = scalar_lea.hbm %s880_s13, 128  ;;  %s1375_s21 = scalar_lea.hbm %s1781_s8, 256 }
 0x260   : > { %p1372_p6 = scmp.ne.s32.totalorder %s880_s13, %s1371_s11  ;;  %p1376_p13 = scmp.lt.s32.totalorder %s880_s13, %s1781_s8 }
 0x261   : > { %p1377_p12 = scmp.lt.s32.totalorder %s1375_s21, %s1371_s11 }
 0x262   : > { %p1373_p7 = pnand %p1372_p6, %p1808_p10 }
 0x263   : > { %p1378_p0 = por %p1377_p12, %p1376_p13 }
 0x264   : > { %p1374_p11 = pneg %p1373_p7 }
 0x266   : > { %p1379_p5 = pnand %p1378_p0, %p1374_p11 }
 0x268   : > { %1382 = shalt.err (!%p1379_p5)
}
 0x269   : > { %1147 = dma.vmem_to_hbm [thread:$0]  (%p1808_p10), %s883_s5, 128, %s880_s13, %s869_s18  }
 0x26a PF: > { %s894_s2 = sand.u32 1, %s1421_s27   ;;  %p1809_p1 = scmp.ne.s32.totalorder %s1791_s12, 0 }
 0x26b   : > { %p1810_p2 = scmp.ge.s32.totalorder %s1433_s30, 2  ;;  %s895_s14 = scalar_lea.sflag [#allocation4], %s894_s2 }
 0x26d   : > { %p1167_p3 = pnand %p1810_p2, %p1809_p1 }
 0x26f   : > { %p1168_p9 = pneg %p1167_p3 }
 0x271   : > { %1416 = dma.done.wait (%p1168_p9), %s895_s14, 128  }
 0x272   : > { %1418 = vsyncadd (%p1168_p9), %s895_s14, 4294967168  ;;  %p25_p4 = scmp.ge.s32.totalorder %s1564_s19, 4   ;;  %s1811_s27 = smov %s1425_s28 }
 0x273   : > { %s1812_s28 = smov %s1429_s29  ;;  %s1813_s29 = smov %s1582_s16 }
 0x274   : > { %s1814_s30 = smov %s1564_s19  ;;  %27 = sbr.rel (!%p25_p4) target bundleno = 13 (0xd), region = 122 }
 0x279   :  { %900 = vsyncpa [#allocation3], 1 }
 0x27a   :  { %902 = vsyncpa [#allocation3 + $0x1], 1 }
 0x27b   :  { %903 = vsyncpa [#allocation6], 1 }
 0x27c   :  { %905 = vsyncpa [#allocation6 + $0x1], 1 }
 0x27d   :  { %906 = vsyncpa [#allocation9], 1 }
 0x27e   :  { %907 = vsyncpa [#allocation4], 1 }
 0x27f   :  { %909 = vsyncpa [#allocation4 + $0x1], 1 }

</bundles_post_ra>
